<compile_context>
chip_gen: v7x
topology: tpu7x:2x2x1
jax: 0.10.0
libtpu: 0.0.40
codegen_flags: <defaults>
</compile_context>

<pallas_src>
import jax
import jax.numpy as jnp
from jax.experimental import pallas as pl
from jax.experimental.pallas import tpu as pltpu


# ---------------------------------------------------------------------------
# Pallas kernel (lane-dense 2D view): inputs are flattened to
# (rows, cols) = (N*C, H*W); the (1, tile_cols) mask block broadcasts over the
# row dimension inside the kernel.  The mask bank is hard-binary, so a single
# vsel per vreg replaces the 2 vmul + 1 vsub lerp (exact for 0/1 masks).
# ---------------------------------------------------------------------------
def _blend_kernel(mask_ref, x_ref, xuwm_ref, o_ref):
    m = mask_ref[...]                                # (1, tc) bf16, values {0, 1}
    o_ref[...] = jnp.where(m != 0, xuwm_ref[...], x_ref[...])


def _row_unit(dtype):
    # Native sublane tiling: (8,128) f32, (16,128) bf16, (32,128) int8.
    return max(8, 32 // jnp.dtype(dtype).itemsize)


def _pick_tile(dim, unit, target):
    """Largest multiple of `unit` that evenly divides `dim` and is <= target.
    If dim <= target, the full extent is used (always a legal block dim)."""
    if dim <= target:
        return dim
    if dim % unit != 0:
        # Callers pad large dims to a multiple of `unit` before splitting, so
        # this branch only triggers for small extents already handled above.
        return dim
    best = unit
    t = 2 * unit
    while t <= target:
        if dim % t == 0:
            best = t
        t += unit
    return best


def _vmem_capacity_bytes():
    try:
        return int(pltpu.get_tpu_info().vmem_capacity_bytes)
    except Exception:
        return 64 << 20        # conservative fallback: assume v7x per-TC VMEM


def _pad_axis_to(a, axis, mult):
    pad = (-a.shape[axis]) % mult
    if pad == 0:
        return a
    widths = [(0, 0)] * a.ndim
    widths[axis] = (0, pad)
    return jnp.pad(a, widths)


def watermark_blend(x, x_uwm, mask_hw, *, in_place=False):
    """x, x_uwm: (N, C, H, W); mask_hw: (H, W) hard-binary mask in {0, 1}.

    out = x_uwm * mask + x * (1 - mask), with mask broadcast over N and C.
    With in_place=True the output aliases x_uwm's buffer (caller must not
    reuse x_uwm afterwards).
    """
    N, C, H, W = x.shape
    assert x_uwm.shape == x.shape and mask_hw.shape == (H, W)
    R, L = N * C, H * W
    itemsize = jnp.dtype(x.dtype).itemsize
    row_unit = _row_unit(x.dtype)

    # Lane-dense flat views: H*W maps onto the 128-lane axis -> full-width vst.
    x2 = x.reshape(R, L)
    xu2 = x_uwm.reshape(R, L)
    m2 = mask_hw.reshape(1, L).astype(jnp.bfloat16)   # compact binary mask

    # Pad odd extents instead of falling back to a single full-extent block
    # (which could silently blow past VMEM on large non-128-divisible H*W).
    if L > 128 and L % 128 != 0:
        lane_mult = 1024 if L > 1024 else 128
        x2 = _pad_axis_to(x2, 1, lane_mult)
        xu2 = _pad_axis_to(xu2, 1, lane_mult)
        m2 = _pad_axis_to(m2, 1, lane_mult)
    if R > row_unit and R % row_unit != 0:
        x2 = _pad_axis_to(x2, 0, row_unit)
        xu2 = _pad_axis_to(xu2, 0, row_unit)
    Rp, Lp = x2.shape

    # Generation-aware tile / VMEM budgets.
    vmem_cap = _vmem_capacity_bytes()
    if vmem_cap >= (96 << 20):             # v5e / v6e: 128 MiB physical VMEM
        lane_target, row_target = 8192, 512
        blk_budget = 8 << 20               # per-operand block bytes
        vmem_ceiling = 96 << 20
    else:                                   # v7x: 64 MiB per TensorCore
        lane_target, row_target = 4096, 512
        blk_budget = 4 << 20
        vmem_ceiling = 48 << 20

    # Lane axis first (wide, unmasked stores), then spend the remaining
    # per-operand block budget on rows; widen lanes again if rows are small.
    tc = _pick_tile(Lp, 128, lane_target)
    row_budget = max(row_unit, (blk_budget // (tc * itemsize)) // row_unit * row_unit)
    tr = _pick_tile(Rp, row_unit, min(row_target, row_budget))
    lane_budget = max(tc, (blk_budget // (tr * itemsize)) // 128 * 128)
    tc = _pick_tile(Lp, 128, min(lane_budget, Lp))

    # Keep >= 2 (preferably >= 4) grid steps on real workloads so megacore
    # sharding gives both v7x TensorCores work; tiny arrays stay single-step.
    if Rp * Lp * itemsize >= (2 << 20):
        while (Rp // tr) * (Lp // tc) < 4:
            if tc % 256 == 0 and tc >= 1024:
                tc //= 2
            elif tr % (2 * row_unit) == 0:
                tr //= 2
            else:
                break

    # Outer axis = lane blocks, inner axis = row blocks: the mask block index
    # only changes on the OUTER axis, so it is not re-fetched every inner step.
    grid = (Lp // tc, Rp // tr)
    n_steps = grid[0] * grid[1]
    blk = tr * tc * itemsize
    mblk = tc * 2                           # bf16 mask row bytes

    def img_map(j, i):
        return (i, j)

    def msk_map(j, i):
        return (0, j)

    # When tile growth is blocked (small blocks but many steps), deepen the
    # input pipeline so DMA issue latency between short steps is hidden.
    tri_buffer = (blk < (1 << 20)) and (n_steps >= 4)
    if tri_buffer:
        img_in_spec = pl.BlockSpec((tr, tc), img_map, pipeline_mode=pl.Buffered(3))
    else:
        img_in_spec = pl.BlockSpec((tr, tc), img_map)
    out_spec = pl.BlockSpec((tr, tc), img_map)
    msk_spec = pl.BlockSpec((1, tc), msk_map)

    bufs = 3 if tri_buffer else 2
    working = bufs * 3 * blk + 2 * mblk
    vmem_limit = int(min(max(int(working * 1.25), 32 << 20), vmem_ceiling))

    out2 = pl.pallas_call(
        _blend_kernel,
        out_shape=jax.ShapeDtypeStruct((Rp, Lp), x.dtype),
        grid=grid,
        in_specs=[msk_spec, img_in_spec, img_in_spec],
        out_specs=out_spec,
        input_output_aliases=({2: 0} if in_place else {}),
        compiler_params=pltpu.CompilerParams(
            dimension_semantics=("parallel", "parallel"),
            vmem_limit_bytes=vmem_limit,
        ),
    )(m2, x2, xu2)

    if (Rp, Lp) != (R, L):
        out2 = out2[:R, :L]
    return out2.reshape(N, C, H, W)


# ---------------------------------------------------------------------------
# Glue: nearest-neighbor resize (approximates PIL.Image.NEAREST) + module shim
# ---------------------------------------------------------------------------
def nearest_resize(mask_hw, out_h, out_w):
    mh, mw = mask_hw.shape
    rows = jnp.clip(
        jnp.floor((jnp.arange(out_h) + 0.5) * mh / out_h).astype(jnp.int32), 0, mh - 1)
    cols = jnp.clip(
        jnp.floor((jnp.arange(out_w) + 0.5) * mw / out_w).astype(jnp.int32), 0, mw - 1)
    return mask_hw[rows][:, cols]


class RandomWatermarkRemoval:
    """JAX/Pallas re-implementation of the blend hot path.

    # TODO(synk): the upstream module loads mask PNGs via glob/PIL; replaced by
    # a deterministic synthetic hard-binary mask bank (no file I/O available).
    """

    def __init__(self, num_masks=4, mask_hw=(8, 8), seed=0):
        key = jax.random.PRNGKey(seed)
        bank = jax.random.uniform(key, (num_masks,) + tuple(mask_hw), jnp.float32)
        self.masks = (bank > 0.5).astype(jnp.float32)

    def __call__(self, x, x_uwm, mask_idx=None, key=None):
        n, c, h, w = x.shape
        if mask_idx is None:
            key = key if key is not None else jax.random.PRNGKey(1)
            mask_idx = jax.random.randint(key, (), 0, self.masks.shape[0])
        mask = nearest_resize(self.masks[mask_idx], h, w)      # (H, W), 0/1
        # TODO(synk): fuse this gather-resize into the kernel (prefetch mask_idx
        # + row/col indices via PrefetchScalarGridSpec and keep the tiny bank
        # VMEM-resident) to skip the full-res mask HBM roundtrip.
        return watermark_blend(x, x_uwm, mask)


# ---------------------------------------------------------------------------
if __name__ == "__main__":
    key = jax.random.PRNGKey(0)
    k1, k2 = jax.random.split(key)

    N, C, H, W = 2, 4, 16, 16
    x = jax.random.normal(k1, (N, C, H, W), jnp.float32)
    x_uwm = jax.random.normal(k2, (N, C, H, W), jnp.float32)

    module = RandomWatermarkRemoval(num_masks=4, mask_hw=(8, 8), seed=0)
    out = jax.block_until_ready(module(x, x_uwm, mask_idx=2))

    # Pure-JAX reference (lerp with the same binary mask == select).
    mask_ref = nearest_resize(module.masks[2], H, W)[None, None]
    ref = x_uwm * mask_ref + x * (1.0 - mask_ref)
    assert out.shape == (N, C, H, W)
    assert jnp.allclose(out, ref, atol=1e-6), "mismatch vs reference"

    print("KERNEL_OK")
</pallas_src>

<mosaic_0001>
module attributes {stable_mosaic.version = 11 : i64} {
  func.func @_blend_kernel(%arg0: i32, %arg1: i32, %arg2: memref<1x256xbf16, #tpu.memory_space<vmem>>, %arg3: memref<8x256xf32, #tpu.memory_space<vmem>>, %arg4: memref<8x256xf32, #tpu.memory_space<vmem>>, %arg5: memref<8x256xf32, #tpu.memory_space<vmem>>) attributes {dimension_semantics = [#tpu.dimension_semantics<parallel>, #tpu.dimension_semantics<parallel>], iteration_bounds = array<i64: 1, 1>, scalar_prefetch = 0 : i64, scratch_operands = 0 : i64, tpu.core_type = #tpu.core_type<tc>, window_params = [{transform_indices = @transform_0, window_bounds = array<i64: 1, 256>}, {transform_indices = @transform_1, window_bounds = array<i64: 8, 256>}, {transform_indices = @transform_2, window_bounds = array<i64: 8, 256>}, {transform_indices = @transform_3, window_bounds = array<i64: 8, 256>}]} {
    %c0 = arith.constant 0 : index
    %c0_0 = arith.constant 0 : index
    %0 = vector.load %arg2[%c0, %c0_0] : memref<1x256xbf16, #tpu.memory_space<vmem>>, vector<1x256xbf16>
    %cst = arith.constant 0.000000e+00 : bf16
    %1 = vector.broadcast %cst : bf16 to vector<1x256xbf16>
    %2 = arith.cmpf one, %0, %1 : vector<1x256xbf16>
    %c0_1 = arith.constant 0 : index
    %c0_2 = arith.constant 0 : index
    %3 = vector.load %arg4[%c0_1, %c0_2] : memref<8x256xf32, #tpu.memory_space<vmem>>, vector<8x256xf32>
    %c0_3 = arith.constant 0 : index
    %c0_4 = arith.constant 0 : index
    %4 = vector.load %arg3[%c0_3, %c0_4] : memref<8x256xf32, #tpu.memory_space<vmem>>, vector<8x256xf32>
    %5 = vector.shape_cast %2 : vector<1x256xi1> to vector<1x256xi1>
    %6 = vector.broadcast %5 : vector<1x256xi1> to vector<8x256xi1>
    %7 = arith.select %6, %3, %4 : vector<8x256xi1>, vector<8x256xf32>
    %c0_5 = arith.constant 0 : index
    %c0_6 = arith.constant 0 : index
    %8 = vector.load %arg5[%c0_5, %c0_6] : memref<8x256xf32, #tpu.memory_space<vmem>>, vector<8x256xf32>
    tpu.vector_store %arg5[%c0_5, %c0_6], %7 {strides = array<i32>} : memref<8x256xf32, #tpu.memory_space<vmem>>, vector<8x256xf32>,
    return
  }
  func.func @transform_0(%arg0: i32, %arg1: i32) -> (i32, i32) {
    %c0_i32 = arith.constant 0 : i32
    %c0_i32_0 = arith.constant 0 : i32
    return %c0_i32, %arg0 : i32, i32
  }
  func.func @transform_1(%arg0: i32, %arg1: i32) -> (i32, i32) {
    %c0_i32 = arith.constant 0 : i32
    return %arg1, %arg0 : i32, i32
  }
  func.func @transform_2(%arg0: i32, %arg1: i32) -> (i32, i32) {
    %c0_i32 = arith.constant 0 : i32
    return %arg1, %arg0 : i32, i32
  }
  func.func @transform_3(%arg0: i32, %arg1: i32) -> (i32, i32) {
    %c0_i32 = arith.constant 0 : i32
    return %arg1, %arg0 : i32, i32
  }
}

</mosaic_0001>

<bundles_post_ra>
// kernel: tpu_custom_call.1
= control target key start
LH: loop header
LB: loop body
LE: loop exit
PB: predicated region body
PF: predicated region fallthrough
CT: control target
= control target key end

     0   :  { %8 = vsyncpa [#allocation3], 0  ;;  %s277_s0 = inlined_call_operand.hbm [shape: bf16[1,256], index: 0, kind: input, shape index: {}]   ;;  %s278_s1 = inlined_call_operand.hbm [shape: f32[8,256], index: 1, kind: input, shape index: {}]   ;;  %s279_s2 = inlined_call_operand.hbm [shape: f32[8,256], index: 2, kind: input, shape index: {}]   ;;  %s280_s3 = inlined_call_operand.hbm [shape: f32[8,256], index: 3, kind: output, shape index: {}]  }
   0x1   :  { %9 = vsyncpa [#allocation6], 0 }
   0x2   :  { %10 = vsyncpa [#allocation4], 0  ;;  %s204_s12 = smov [#allocation5]   ;;  %s205_s14 = smov [#allocation2]  }
   0x3   :  { %s27_s13 = sshll.u32 %s204_s12, 4  ;;  %s17_s15 = sshll.u32 %s205_s14, 4  ;;  %s28_s13 = int_to_ptr.vmem [resolvable:$true] %s27_s13  ;;  %s18_s15 = int_to_ptr.vmem [resolvable:$true] %s17_s15 }
   0x4   :  { %s110_s18 = scalar_lea.hbm %s278_s1, 256 }
   0x5   :  { %p111_p0 = scmp.ne.s32.totalorder %s278_s1, %s110_s18  ;;  %p114_p1 = scmp.lt.u32.totalorder %s110_s18, %s278_s1 }
   0x7   :  { %p116_p2 = pnand %p114_p1, %p111_p0 }
   0x9   :  { %119 = shalt.err (!%p116_p2)
}
   0xa   :  { %s120_s23 = scalar_lea.vmem %s28_s13, 256  ;;  %p125_p4 = scmp.lt.s32.totalorder %s28_s13, %s28_s13 }
   0xb   :  { %p121_p3 = scmp.ne.s32.totalorder %s28_s13, %s120_s23  ;;  %p126_p5 = scmp.lt.s32.totalorder %s120_s23, %s120_s23 }
   0xd   :  { %p127_p6 = por %p126_p5, %p125_p4 }
   0xf   :  { %p128_p7 = pnand %p127_p6, %p121_p3 }
  0x11   :  { %131 = shalt.err (!%p128_p7)
}
  0x12   :  { %30 = dma.hbm_to_vmem [thread:$0]  %s278_s1, 256, %s28_s13, [#allocation6]  }
  0x13   :  { %s132_s28 = scalar_lea.hbm %s277_s0, 32 }
  0x14   :  { %p133_p8 = scmp.ne.s32.totalorder %s277_s0, %s132_s28  ;;  %p136_p9 = scmp.lt.u32.totalorder %s132_s28, %s277_s0 }
  0x16   :  { %p138_p10 = pnand %p136_p9, %p133_p8 }
  0x18   :  { %141 = shalt.err (!%p138_p10)
}
  0x19   :  { %s142_s6 = scalar_lea.vmem %s18_s15, 32  ;;  %p147_p12 = scmp.lt.s32.totalorder %s18_s15, %s18_s15 }
  0x1a   :  { %p143_p11 = scmp.ne.s32.totalorder %s18_s15, %s142_s6  ;;  %p148_p13 = scmp.lt.s32.totalorder %s142_s6, %s142_s6 }
  0x1c   :  { %p149_p0 = por %p148_p13, %p147_p12 }
  0x1e   :  { %p150_p1 = pnand %p149_p0, %p143_p11 }
  0x20   :  { %153 = shalt.err (!%p150_p1)
}
  0x21   :  { %20 = dma.hbm_to_vmem [thread:$0]  %s277_s0, 32, %s18_s15, [#allocation3]  }
  0x22   :  { %s206_s8 = smov [#allocation7]   ;;  %s154_s12 = scalar_lea.hbm %s279_s2, 256 }
  0x23   :  { %s37_s9 = sshll.u32 %s206_s8, 4  ;;  %p155_p2 = scmp.ne.s32.totalorder %s279_s2, %s154_s12  ;;  %s38_s9 = int_to_ptr.vmem [resolvable:$true] %s37_s9 }
  0x24   :  { %p158_p3 = scmp.lt.u32.totalorder %s154_s12, %s279_s2 }
  0x26   :  { %p160_p4 = pnand %p158_p3, %p155_p2 }
  0x28   :  { %163 = shalt.err (!%p160_p4)
}
  0x29   :  { %s164_s18 = scalar_lea.vmem %s38_s9, 256  ;;  %p169_p6 = scmp.lt.s32.totalorder %s38_s9, %s38_s9 }
  0x2a   :  { %p165_p5 = scmp.ne.s32.totalorder %s38_s9, %s164_s18  ;;  %p170_p7 = scmp.lt.s32.totalorder %s164_s18, %s164_s18 }
  0x2c   :  { %p171_p8 = por %p170_p7, %p169_p6 }
  0x2e   :  { %p172_p9 = pnand %p171_p8, %p165_p5 }
  0x30   :  { %175 = shalt.err (!%p172_p9)
}
  0x31   :  { %40 = dma.hbm_to_vmem [thread:$0]  %s279_s2, 256, %s38_s9, [#allocation6]  }
  0x32   :  { %198 = dma.done.wait [#allocation3], 32  }
  0x33   :  { %199 = vsyncadd [#allocation3], 4294967264 }
  0x34   :  { %200 = dma.done.wait [#allocation6], 512  }
  0x35   :  { %201 = vsyncadd [#allocation6], 4294966784  ;;  %v63_v0 = vlaneseq  ;;  %v53_v2 = vld [vmem:[#allocation2] sm:$0x3]  ;;  %v207_v3 = vmov 0   ;;  %v55_v11 = vld [vmem:[#allocation7] sm:$0xff] }
  0x36   :  { %vm54_vm0 = vcmp.ne.bf16.partialorder %v53_v2, 0  ;;  %s208_s2 = smov [#allocation8]   ;;  %v57_v14 = vld [vmem:[#allocation5] sm:$0xff]  ;;  %v56_v16 = vld [vmem:[#allocation7 + $0x8] sm:$0xff]  ;;  %v58_v17 = vld [vmem:[#allocation5 + $0x8] sm:$0xff] }
  0x37   :  { %v64_v1 = vshrl.u32 %v63_v0, 7  ;;  %v59_v4 = vsel %vm54_vm0, 65537, %v207_v3  ;;  %s95_s19 = sshll.u32 %s208_s2, 4  ;;  %s96_s19 = int_to_ptr.vmem [resolvable:$true] %s95_s19 }
  0x38   :  { %v60_v5 = vunpack.c.l.b16 %v59_v4  ;;  %s176_s20 = scalar_lea.vmem %s96_s19, 256  ;;  %p181_p11 = scmp.lt.s32.totalorder %s96_s19, %s96_s19 }
  0x39   :  { %v65_v6 = vsub.s32 0, %v64_v1  ;;  %v69_v7 = vsub.s32 2, %v64_v1  ;;  %p177_p10 = scmp.ne.s32.totalorder %s96_s19, %s176_s20  ;;  %p182_p12 = scmp.lt.s32.totalorder %s176_s20, %s176_s20 }
  0x3a   :  { %vm61_vm1 = vcmp.ne.s32.totalorder %v60_v5, 0 }
  0x3b   :  { %v62_v8 = vsel %vm61_vm1, 1, %v207_v3  ;;  %p183_p13 = por %p182_p12, %p181_p11 }
  0x3c   :  { %v66_v9 = vrot.slane %v62_v8, %v65_v6  ;;  %v70_v10 = vrot.slane %v62_v8, %v69_v7 }
  0x3d   :  { %p184_p0 = pnand %p183_p13, %p177_p10 }
  0x3e   :  { %vm71_vm2 = vcmp.ne.s32.totalorder %v66_v9, 0  ;;  %vm72_vm3 = vcmp.ne.s32.totalorder %v70_v10, 0 }
  0x3f   :  { %v73_v12 = vsel %vm71_vm2, 1, %v207_v3  ;;  %v74_v13 = vsel %vm72_vm3, 1, %v207_v3 }
  0x40   :  { %v78_v15 = vrot.slane %v73_v12, %v65_v6  ;;  %v82_v18 = vrot.slane %v74_v13, %v65_v6 }
  0x42   :  { %vm83_vm4 = vcmp.eq.s32.totalorder %v78_v15, 1  ;;  %vm84_vm5 = vcmp.eq.s32.totalorder %v82_v18, 1 }
  0x43   :  { %v85_v19 = vsel %vm83_vm4, %v55_v11, %v57_v14  ;;  %v86_v20 = vsel %vm84_vm5, %v56_v16, %v58_v17 }
  0x44   :  { %87 = vst [vmem:[#allocation8] sm:$0xff] %v85_v19  ;;  %88 = vst [vmem:[#allocation8 + $0x8] sm:$0xff] %v86_v20 }
  0x45   :  { %187 = shalt.err (!%p184_p0)
}
  0x46   :  { %s188_s23 = scalar_lea.hbm %s280_s3, 256 }
  0x47   :  { %p189_p1 = scmp.ne.s32.totalorder %s280_s3, %s188_s23  ;;  %p192_p2 = scmp.lt.u32.totalorder %s188_s23, %s280_s3 }
  0x49   :  { %p194_p3 = pnand %p192_p2, %p189_p1 }
  0x4b   :  { %197 = shalt.err (!%p194_p3)
}
  0x4c   :  { %98 = dma.vmem_to_hbm [thread:$0]  %s96_s19, 256, %s280_s3, [#allocation4]  }
  0x4d   :  { %202 = dma.done.wait [#allocation4], 256  }
  0x4e   :  { %203 = vsyncadd [#allocation4], 4294967040 }
  0x4f   :  { %102 = vsyncpa [#allocation3], 1 }
  0x50   :  { %103 = vsyncpa [#allocation6], 1 }
  0x51   :  { %104 = vsyncpa [#allocation4], 1 }

</bundles_post_ra>
